<compile_context>
chip_gen: v5e
topology: v5e:2x2
jax: 0.10.0
libtpu: 0.0.40
codegen_flags: <defaults>
</compile_context>

<pallas_src>
import jax
import jax.numpy as jnp
from jax import lax
from jax.experimental import pallas as pl
from jax.experimental.pallas import tpu as pltpu


def linear_embedding_kernel(x_ref, w_ref, b_ref, out_ref):
    # x_ref:  (TB, C, HW)  bf16 or f32 (streamed from HBM, double-buffered)
    # w_ref:  (C, E)       f32, fused (base @ linear) weight with 1/HW folded in
    # b_ref:  (1, E)       f32, fused bias
    # out_ref:(TB, E)      f32
    x = x_ref[...].astype(jnp.float32)          # widen once; all math in f32
    pooled = jnp.sum(x, axis=2)                 # (TB, C)  -- 1/HW lives in w_ref
    emb = jnp.dot(pooled, w_ref[...],
                  preferred_element_type=jnp.float32) + b_ref[...]   # (TB, E)

    # F.normalize(p=2, dim=1): x / max(||x||, 1e-12)  ==  x * rsqrt(max(||x||^2, 1e-24))
    sumsq = jnp.sum(emb * emb, axis=1, keepdims=True)
    inv = lax.rsqrt(jnp.maximum(sumsq, 1e-24))
    out_ref[...] = (emb * inv).astype(out_ref.dtype)


def _pick_batch_tile(B, C, HW, itemsize, budget_bytes=24 << 20):
    """Largest batch tile whose double-buffered x stream fits the VMEM budget."""
    per_row = C * HW * itemsize
    tb = max(8, budget_bytes // (2 * per_row))
    if tb >= B:
        return B                     # single block: block dims == full array dims
    return max(8, (tb // 8) * 8)     # keep the (TB, E) output block sublane-aligned


def linear_embedding(x_nchw, wb, bb, wl_t, bl, *, batch_tile=None):
    """x_nchw: (B, C, H, W); wb: (C, 512); bb: (512,); wl_t: (512, E); bl: (E,)."""
    B, C, H, W = x_nchw.shape
    HW = H * W
    E = bl.shape[-1]
    x3 = x_nchw.reshape(B, C, HW)    # layout: spatial on the lane (fast) axis

    # Offline weight fold (done once per model, tiny): base + Linear + 1/HW scale.
    wb32 = wb.astype(jnp.float32)
    wl32 = wl_t.astype(jnp.float32)
    w_fused = (wb32 / HW) @ wl32                                   # (C, E)
    b_fused = (bb.astype(jnp.float32) @ wl32
               + bl.astype(jnp.float32)).reshape(1, E)             # (1, E)

    itemsize = jnp.dtype(x3.dtype).itemsize
    tb = batch_tile if batch_tile is not None else _pick_batch_tile(B, C, HW, itemsize)
    tb = min(tb, B) if tb >= B else tb
    grid = (pl.cdiv(B, tb),)

    return pl.pallas_call(
        linear_embedding_kernel,
        out_shape=jax.ShapeDtypeStruct((B, E), jnp.float32),
        grid_spec=pltpu.PrefetchScalarGridSpec(
            num_scalar_prefetch=0,
            grid=grid,
            in_specs=[
                pl.BlockSpec((tb, C, HW), lambda i: (i, 0, 0)),   # streamed activation
                pl.BlockSpec((C, E), lambda i: (0, 0)),           # VMEM-resident weight
                pl.BlockSpec((1, E), lambda i: (0, 0)),           # VMEM-resident bias
            ],
            out_specs=pl.BlockSpec((tb, E), lambda i: (i, 0)),
        ),
        compiler_params=pltpu.CompilerParams(
            dimension_semantics=("parallel",),   # shards batch tiles across TCs on v7x
            vmem_limit_bytes=48 << 20,           # explicit; safe under v7x's 64 MiB
        ),
    )(x3, w_fused, b_fused)


def reference(x_nchw_f32, wb, bb, wl_t, bl):
    """Pure-JAX PyTorch-path reference (unfused, mean, sqrt/max/divide)."""
    B = x_nchw_f32.shape[0]
    pooled_c = jnp.mean(x_nchw_f32.reshape(B, x_nchw_f32.shape[1], -1), axis=2)
    pool = pooled_c @ wb + bb
    emb = pool @ wl_t + bl
    norm = jnp.sqrt(jnp.sum(emb * emb, axis=1, keepdims=True))
    return emb / jnp.maximum(norm, 1e-12)


if __name__ == "__main__":
    B, C, H, W = 2, 4, 16, 16
    OUTPUT_SIZE, EMBEDDING_SIZE = 512, 128

    key = jax.random.PRNGKey(0)
    kx, kwb, kbb, kwl, kbl = jax.random.split(key, 5)

    x_f32 = jax.random.normal(kx, (B, C, H, W), dtype=jnp.float32)
    # The HBM-streamed activation path runs in bf16 (half the bytes moved);
    # the kernel accumulates everything in f32.
    x = x_f32.astype(jnp.bfloat16)

    # Synthetic base projection C -> 512 (uniform init a la nn.Linear).
    lim_b = 1.0 / jnp.sqrt(jnp.float32(C))
    wb = jax.random.uniform(kwb, (C, OUTPUT_SIZE), jnp.float32, -lim_b, lim_b)
    bb = jax.random.uniform(kbb, (OUTPUT_SIZE,), jnp.float32, -lim_b, lim_b)

    # nn.Linear(512, 128): weight (128, 512) stored transposed, bias (128,).
    lim_l = 1.0 / jnp.sqrt(jnp.float32(OUTPUT_SIZE))
    wl_t = jax.random.uniform(kwl, (OUTPUT_SIZE, EMBEDDING_SIZE), jnp.float32,
                              -lim_l, lim_l)
    bl = jax.random.uniform(kbl, (EMBEDDING_SIZE,), jnp.float32, -lim_l, lim_l)

    out = jax.block_until_ready(linear_embedding(x, wb, bb, wl_t, bl))

    # Validate against the unfused f32 reference on the same (bf16-rounded) input.
    ref = reference(x.astype(jnp.float32), wb, bb, wl_t, bl)
    assert out.shape == (B, EMBEDDING_SIZE)
    assert jnp.allclose(out, ref, atol=1e-5, rtol=1e-5), "mismatch vs reference"
    assert jnp.allclose(jnp.linalg.norm(out, axis=1), 1.0, atol=1e-5)

    print("KERNEL_OK")
</pallas_src>

<mosaic_0001>
module attributes {stable_mosaic.version = 11 : i64} {
  func.func @linear_embedding_kernel(%arg0: i32, %arg1: memref<2x4x256xbf16, #tpu.memory_space<vmem>>, %arg2: memref<4x128xf32, #tpu.memory_space<vmem>>, %arg3: memref<1x128xf32, #tpu.memory_space<vmem>>, %arg4: memref<2x128xf32, #tpu.memory_space<vmem>>) attributes {dimension_semantics = [#tpu.dimension_semantics<parallel>], iteration_bounds = array<i64: 1>, scalar_prefetch = 0 : i64, scratch_operands = 0 : i64, tpu.core_type = #tpu.core_type<tc>, window_params = [{transform_indices = @transform_0, window_bounds = array<i64: 2, 4, 256>}, {pipeline_mode = #tpu.pipeline_mode<synchronous>, transform_indices = @transform_1, window_bounds = array<i64: 4, 128>}, {pipeline_mode = #tpu.pipeline_mode<synchronous>, transform_indices = @transform_2, window_bounds = array<i64: 1, 128>}, {transform_indices = @transform_3, window_bounds = array<i64: 2, 128>}]} {
    %c0 = arith.constant 0 : index
    %c0_0 = arith.constant 0 : index
    %c0_1 = arith.constant 0 : index
    %0 = vector.load %arg1[%c0, %c0_0, %c0_1] : memref<2x4x256xbf16, #tpu.memory_space<vmem>>, vector<2x4x256xbf16>
    %1 = arith.extf %0 : vector<2x4x256xbf16> to vector<2x4x256xf32>
    %cst = arith.constant dense<0.000000e+00> : vector<2x4xf32>
    %2 = vector.multi_reduction <add>, %1, %cst [2] : vector<2x4x256xf32> to vector<2x4xf32>
    %c0_2 = arith.constant 0 : index
    %c0_3 = arith.constant 0 : index
    %3 = vector.load %arg2[%c0_2, %c0_3] : memref<4x128xf32, #tpu.memory_space<vmem>>, vector<4x128xf32>
    %cst_4 = arith.constant dense<0.000000e+00> : vector<2x128xf32>
    %4 = tpu.matmul %2, %3, %cst_4 {dimension_numbers = #tpu.dot_dimension_numbers<[1], [0], [0], [1], [0, 0, 1, 1], [], []>} : vector<2x4xf32>, vector<4x128xf32>, vector<2x128xf32> -> vector<2x128xf32>
    %c0_5 = arith.constant 0 : index
    %c0_6 = arith.constant 0 : index
    %5 = vector.load %arg3[%c0_5, %c0_6] : memref<1x128xf32, #tpu.memory_space<vmem>>, vector<1x128xf32>
    %6 = vector.broadcast %5 : vector<1x128xf32> to vector<2x128xf32>
    %7 = arith.addf %4, %6 : vector<2x128xf32>
    %8 = arith.mulf %7, %7 : vector<2x128xf32>
    %cst_7 = arith.constant dense<0.000000e+00> : vector<2xf32>
    %9 = vector.multi_reduction <add>, %8, %cst_7 [1] : vector<2x128xf32> to vector<2xf32>
    %10 = vector.shape_cast %9 : vector<2xf32> to vector<2x1xf32>
    %cst_8 = arith.constant 1.000000e-24 : f32
    %11 = vector.broadcast %cst_8 : f32 to vector<2x1xf32>
    %12 = arith.maximumf %10, %11 : vector<2x1xf32>
    %13 = math.rsqrt %12 : vector<2x1xf32>
    %14 = vector.broadcast %13 : vector<2x1xf32> to vector<2x128xf32>
    %15 = arith.mulf %7, %14 : vector<2x128xf32>
    %c0_9 = arith.constant 0 : index
    %c0_10 = arith.constant 0 : index
    %16 = vector.load %arg4[%c0_9, %c0_10] : memref<2x128xf32, #tpu.memory_space<vmem>>, vector<2x128xf32>
    tpu.vector_store %arg4[%c0_9, %c0_10], %15 {strides = array<i32>} : memref<2x128xf32, #tpu.memory_space<vmem>>, vector<2x128xf32>,
    return
  }
  func.func @transform_0(%arg0: i32) -> (i32, i32, i32) {
    %c0_i32 = arith.constant 0 : i32
    %c0_i32_0 = arith.constant 0 : i32
    %c0_i32_1 = arith.constant 0 : i32
    return %arg0, %c0_i32, %c0_i32_0 : i32, i32, i32
  }
  func.func @transform_1(%arg0: i32) -> (i32, i32) {
    %c0_i32 = arith.constant 0 : i32
    %c0_i32_0 = arith.constant 0 : i32
    %c0_i32_1 = arith.constant 0 : i32
    return %c0_i32, %c0_i32_0 : i32, i32
  }
  func.func @transform_2(%arg0: i32) -> (i32, i32) {
    %c0_i32 = arith.constant 0 : i32
    %c0_i32_0 = arith.constant 0 : i32
    %c0_i32_1 = arith.constant 0 : i32
    return %c0_i32, %c0_i32_0 : i32, i32
  }
  func.func @transform_3(%arg0: i32) -> (i32, i32) {
    %c0_i32 = arith.constant 0 : i32
    %c0_i32_0 = arith.constant 0 : i32
    return %arg0, %c0_i32 : i32, i32
  }
}

</mosaic_0001>

<bundles_post_ra>
// kernel: tpu_custom_call.1
= control target key start
LH: loop header
LB: loop body
LE: loop exit
PB: predicated region body
PF: predicated region fallthrough
CT: control target
= control target key end

     0   :  { %8 = vsyncpa [#allocation3], 0  ;;  %s277_s0 = inlined_call_operand.hbm [shape: bf16[2,4,256], index: 0, kind: input, shape index: {}]   ;;  %s278_s1 = inlined_call_operand.hbm [shape: f32[4,128], index: 1, kind: input, shape index: {}]   ;;  %s279_s2 = inlined_call_operand.vmem [shape: f32[1,128], index: 2, kind: input, shape index: {}]   ;;  %s280_s3 = inlined_call_operand.hbm [shape: f32[2,128], index: 3, kind: output, shape index: {}]  }
   0x1   :  { %9 = vsyncpa [#allocation6], 0 }
   0x2   :  { %10 = vsyncpa [#allocation4], 0  ;;  %s15_s14 = sshll.u32 %s277_s0, 4  ;;  %s240_s15 = smov [#allocation2]   ;;  %s16_s14 = int_to_ptr.hbm [resolvable:$true] %s15_s14 }
   0x3   :  { %s17_s16 = sshll.u32 %s240_s15, 4  ;;  %s29_s19 = sshll.u32 %s278_s1, 4  ;;  %s18_s16 = int_to_ptr.vmem [resolvable:$true] %s17_s16  ;;  %s30_s19 = int_to_ptr.hbm [resolvable:$true] %s29_s19 }
   0x4   :  { %s241_s20 = smov 64   ;;  %s242_s21 = smov 4  }
   0x5   :  { %23 = dma.hbm_to_vmem [thread:$0]  %s16_s14, 128, %s18_s16, [#allocation3], %s241_s20, %s241_s20, %s242_s21  }
   0x6   :  { %s243_s22 = smov [#allocation5]  }
   0x7   :  { %s31_s23 = sshll.u32 %s243_s22, 4  ;;  %s32_s23 = int_to_ptr.vmem [resolvable:$true] %s31_s23 }
   0x8   :  { %34 = dma.hbm_to_vmem [thread:$0]  %s30_s19, 64, %s32_s23, [#allocation6]  }
   0x9   :  { %234 = dma.done.wait [#allocation3], 128  }
   0xa   :  { %235 = vsyncadd [#allocation3], 4294967168 }
   0xb   :  { %236 = dma.done.wait [#allocation6], 64  }
   0xc   :  { %237 = vsyncadd [#allocation6], 4294967232  ;;  %v151_v0 = vld [vmem:[#allocation2] sm:$0xff]   ;;  %vm62_vm0 = vcmask 1043456   ;;  %v73_v13 = vld [vmem:[#allocation5] sm:$0xf]  ;;  %v80_v15 = vlaneseq }
   0xd   :  { %v152_v1 = vunpack.c.l.bf16 %v151_v0  ;;  %v153_v2 = vunpack.c.h.bf16 %v151_v0  ;;  %148 = vmatpush.msk.msra.mxu0 %vm62_vm0, %v73_v13  ;;  %vm84_vm1 = vcmask 1041409   ;;  %vm86_vm2 = vcmask 31744   ;;  %v159_v21 = vld [vmem:[%s279_s2] ss:$0 sm:$0xff]  ;;  %s244_s24 = smov [#allocation7]   ;;  %s137_s27 = sshll.u32 %s280_s3, 4  ;;  %s138_s27 = int_to_ptr.hbm [resolvable:$true] %s137_s27 }
   0xe   :  { %v81_v16 = vand.u32 127, %v80_v15  ;;  %vm113_vm3 = vcmask 1041408   ;;  %s135_s25 = sshll.u32 %s244_s24, 4  ;;  %s136_s25 = int_to_ptr.vmem [resolvable:$true] %s135_s25 }
   0xf   :  { %51 = vst [vmem:[#allocation1] ss:$2 sm:$0xff] %v152_v1 }
  0x10   :  { %55 = vst [vmem:[#allocation1 + $0x10] ss:$2 sm:$0xff] %v153_v2 }
  0x16   :  { %v52_v3 = vld.sshfl [vmem:[#allocation1] sm:$0xff pattern:$0x75316420]  ;;  %v53_v4 = vld.sshfl [vmem:[#allocation1 + $0x8] sm:$0xff pattern:$0x75316420] }
  0x17   :  { %v63_v5 = vsel %vm62_vm0, %v52_v3, 0.0  ;;  %v64_v6 = vsel %vm62_vm0, %v53_v4, 0.0  ;;  %v56_v8 = vld.sshfl [vmem:[#allocation1 + $0x10] sm:$0xff pattern:$0x75316420] }
  0x18   :  { %v65_v7 = vadd.f32 %v64_v6, %v63_v5  ;;  %v57_v9 = vld.sshfl [vmem:[#allocation1 + $0x18] sm:$0xff pattern:$0x75316420]  ;;  %v68_v10 = vsel %vm62_vm0, %v56_v8, 0.0 }
  0x19   :  { %v69_v11 = vsel %vm62_vm0, %v57_v9, 0.0 }
  0x1a   :  { %66 = vadd.xlane.f32.xlu0 %v65_v7  ;;  %v70_v12 = vadd.f32 %v69_v11, %v68_v10 }
  0x22   :  { %71 = vadd.xlane.f32.xlu0 %v70_v12 }
  0x8d   :  { %v67_v14 = vpop.xlane.xlu0 %66 }
  0x8e   :  { %v82_v18 = vperm.slane %v67_v14, %v81_v16 }
  0x95   :  { %v72_v17 = vpop.xlane.xlu0 %71 }
  0x96   :  { %v83_v19 = vperm.slane %v72_v17, %v81_v16 }
  0x98   :  { %v85_v20 = vsel %vm84_vm1, %v83_v19, %v82_v18 }
  0x99   :  { %149 = vmatmul.msk.f32.vlgmr.msra.gmra.mxu0 %vm86_vm2, %v85_v20 }
 0x116   :  { %v109_v22 = vpop.f32.mrf.mxu0 }
 0x117   :  { %v110_v23 = vadd.f32 %v159_v21, %v109_v22 }
 0x119   :  { %v112_v24 = vmul.f32 %v110_v23, %v110_v23 }
 0x11b   :  { %v114_v25 = vsel %vm113_vm3, %v112_v24, 0.0 }
 0x11c   :  { %115 = vadd.xlane.f32.xlu1 %v114_v25 }
 0x18f   :  { %v116_v26 = vpop.xlane.xlu1 %115 }
 0x190   :  { %v117_v27 = vmax.f32 %v116_v26, 1e-24 }
 0x192   :  { %160 = vrsqrt.f32 %v117_v27  ;;  %vm124_vm5 = vweird.f32 %v117_v27 }
 0x198   :  { %v161_v28 = vpop.eup %160 }
 0x199   :  { %v119_v29 = vmul.f32 %v161_v28, %v117_v27  ;;  %vm125_vm4 = vweird.f32 %v161_v28 }
 0x19a   :  { %vm126_vm6 = vmor %vm124_vm5, %vm125_vm4 }
 0x19b   :  { %v120_v30 = vmul.f32 %v161_v28, %v119_v29 }
 0x19d   :  { %v121_v31 = vmul.f32 0.5, %v120_v30 }
 0x19f   :  { %v122_v32 = vsub.f32 1.5, %v121_v31 }
 0x1a1   :  { %v123_v33 = vmul.f32 %v161_v28, %v122_v32 }
 0x1a3   :  { %v127_v34 = vsel %vm126_vm6, %v161_v28, %v123_v33 }
 0x1a4   :  { %v128_v35 = vmul.f32 %v127_v34, %v110_v23 }
 0x1a6   :  { %129 = vst [vmem:[#allocation7] sm:$0x3] %v128_v35 }
 0x1a7   :  { %140 = dma.vmem_to_hbm [thread:$0]  %s136_s25, 32, %s138_s27, [#allocation4]  }
 0x1a8   :  { %238 = dma.done.wait [#allocation4], 32  }
 0x1a9   :  { %239 = vsyncadd [#allocation4], 4294967264 }
 0x1aa   :  { %145 = vsyncpa [#allocation3], 1 }
 0x1ab   :  { %146 = vsyncpa [#allocation6], 1 }
 0x1ac   :  { %147 = vsyncpa [#allocation4], 1 }

</bundles_post_ra>
